<compile_context>
chip_gen: v5e
topology: v5e:2x2
jax: 0.10.0
libtpu: 0.0.40
codegen_flags: <defaults>
</compile_context>

<pallas_src>
import jax
import jax.numpy as jnp
from jax.experimental import pallas as pl
from jax.experimental.pallas import tpu as pltpu


FILTER_SIZES = (2, 4, 6, 8)
FS_MAX = max(FILTER_SIZES)
NF_PAD = 128                          # lane-dense slab width for all conv banks
F_SLOT = NF_PAD // len(FILTER_SIZES)  # 32 lanes reserved per bank
OUT_PAD = 128                         # lane-dense FC / softmax / output width


def _round_up(x, m):
    return (x + m - 1) // m * m


def cnn1d_kernel(xcol_ref, w_ref, b_ref, mask_ref, fcw_ref, fcb_ref, out_ref):
    """Fused conv-bank matmul + ReLU + masked max-pool + FC + log_softmax.

    xcol_ref : (TB, L_out_pad, FS_MAX*E) bf16  pre-packed im2col activations
    w_ref    : (FS_MAX*E, 128)           bf16  packed conv weights (taps zero-padded)
    b_ref    : (1, 128)                  f32   packed conv bias
    mask_ref : (L_out_pad, 128)          f32   1.0 where (time, filter) is valid
    fcw_ref  : (128, 128)                bf16  packed FC weight (zero pad rows/cols)
    fcb_ref  : (1, 128)                  f32   FC bias (-1e30 on padded class lanes)
    out_ref  : (TB, 128)                 f32   log-probabilities (padded lanes ~ -1e30)
    """
    tb, l_out, k = xcol_ref.shape

    # One large-K MXU matmul for all 4 conv banks (bf16 in, f32 accumulate).
    xcol = xcol_ref[...].reshape(tb * l_out, k)               # stays bf16
    acc = jnp.dot(xcol, w_ref[...],
                  preferred_element_type=jnp.float32)          # (TB*L_out, 128)
    acc = acc.reshape(tb, l_out, NF_PAD)

    acc = jnp.maximum(acc + b_ref[...][None, :, :], 0.0)       # bias + ReLU
    acc = acc * mask_ref[...][None, :, :]                      # kill padded taps/time
    pooled = jnp.max(acc, axis=1)                              # (TB, 128) lane-dense

    # Lane-dense packed FC (padded lanes have zero weight rows / -1e30 bias).
    logits = jnp.dot(pooled.astype(jnp.bfloat16), fcw_ref[...],
                     preferred_element_type=jnp.float32) + fcb_ref[...]

    # log_softmax over 128 lanes; -1e30 pad bias keeps real classes exact.
    m = jnp.max(logits, axis=-1, keepdims=True)
    shifted = logits - m
    lse = jnp.log(jnp.sum(jnp.exp(shifted), axis=-1, keepdims=True))
    out_ref[...] = shifted - lse


@jax.jit
def cnn1d_forward(text, emb_table, conv_ws, conv_bs, fc_w, fc_b):
    """Glue: embedding gather + lane-dense im2col/param packing, one Pallas call."""
    B, L = text.shape
    E = emb_table.shape[1]
    F = conv_ws[0].shape[0]
    OUT = fc_b.shape[0]
    assert F <= F_SLOT, "n_filters must fit in its 32-lane slot"
    assert OUT <= OUT_PAD, "output_dim must fit in 128 lanes"
    assert L >= FS_MAX, "sequence length must cover the largest filter (as in PyTorch)"

    K = FS_MAX * E
    l_out = L - min(FILTER_SIZES) + 1
    l_out_pad = _round_up(l_out, 8)                  # sublane-aligned time extent
    l_pad = _round_up(l_out_pad + FS_MAX - 1, 8)     # tap reach, 8-aligned

    # Embedding lookup (gather) — plain JAX glue; ship activations as bf16.
    # TODO(synk): in-kernel gather via scalar-prefetched ids + HBM DMA.
    embedded = jnp.take(emb_table, text, axis=0).astype(jnp.bfloat16)   # (B, L, E)
    embedded = jnp.pad(embedded, ((0, 0), (0, l_pad - L), (0, 0)))

    # Wrapper-side im2col: lane-dense (B, l_out_pad, FS_MAX*E) bf16 slab.
    xcol = jnp.concatenate(
        [embedded[:, t:t + l_out_pad, :] for t in range(FS_MAX)], axis=-1)

    # Pack all conv banks into one (FS_MAX*E, 128) weight slab + bias + validity
    # mask, and the FC weight into matching (128, 128) rows/cols (zero elsewhere,
    # -1e30 bias on padded class lanes so log_softmax stays exact).
    w_packed = jnp.zeros((K, NF_PAD), jnp.float32)
    b_packed = jnp.zeros((1, NF_PAD), jnp.float32)
    mask = jnp.zeros((l_out_pad, NF_PAD), jnp.float32)
    fcw_packed = jnp.zeros((NF_PAD, OUT_PAD), jnp.float32)
    fcb_packed = jnp.full((1, OUT_PAD), -1e30, jnp.float32)
    fcb_packed = fcb_packed.at[0, :OUT].set(fc_b.astype(jnp.float32))
    for k, fs in enumerate(FILTER_SIZES):
        w = conv_ws[k].astype(jnp.float32)            # (F, E, fs) PyTorch layout
        c0 = k * F_SLOT
        for t in range(fs):
            w_packed = w_packed.at[t * E:(t + 1) * E, c0:c0 + F].set(w[:, :, t].T)
        b_packed = b_packed.at[0, c0:c0 + F].set(conv_bs[k].astype(jnp.float32))
        mask = mask.at[:L - fs + 1, c0:c0 + F].set(1.0)
        fcw_packed = fcw_packed.at[c0:c0 + F, :OUT].set(
            fc_w[:, k * F:(k + 1) * F].astype(jnp.float32).T)
    w_packed = w_packed.astype(jnp.bfloat16)
    fcw_packed = fcw_packed.astype(jnp.bfloat16)

    # Batch tile: large (amortize per-step overhead, fill the MXU M dim), multiple
    # of 8, capped by a conservative VMEM budget (v5e/v7x), and kept to >=2 grid
    # steps when the batch allows (v7x megacore).  Batch is padded to a TB multiple
    # so trailing blocks never see unspecified rows.
    if B <= 8:
        TB = B
    else:
        per_row = l_out_pad * K * 2 * 2 + l_out_pad * NF_PAD * 4 * 2  # 2x-buf bf16 in + f32 acc
        budget = 20 * 1024 * 1024
        tb_cap = max(8, (budget // max(per_row, 1)) // 8 * 8)
        TB = max(8, min(256, _round_up((B + 1) // 2, 8), tb_cap))
    B_pad = _round_up(B, TB)
    if B_pad != B:
        xcol = jnp.pad(xcol, ((0, B_pad - B), (0, 0), (0, 0)))
    grid = (B_pad // TB,)

    out = pl.pallas_call(
        cnn1d_kernel,
        out_shape=jax.ShapeDtypeStruct((B_pad, OUT_PAD), jnp.float32),
        grid=grid,
        in_specs=[
            pl.BlockSpec((TB, l_out_pad, K), lambda i: (i, 0, 0)),   # im2col activations
            pl.BlockSpec((K, NF_PAD), lambda i: (0, 0)),             # conv W (resident)
            pl.BlockSpec((1, NF_PAD), lambda i: (0, 0)),             # conv bias
            pl.BlockSpec((l_out_pad, NF_PAD), lambda i: (0, 0)),     # validity mask
            pl.BlockSpec((NF_PAD, OUT_PAD), lambda i: (0, 0)),       # FC weight
            pl.BlockSpec((1, OUT_PAD), lambda i: (0, 0)),            # FC bias
        ],
        out_specs=pl.BlockSpec((TB, OUT_PAD), lambda i: (i, 0)),
        compiler_params=pltpu.CompilerParams(
            dimension_semantics=("parallel",),
            vmem_limit_bytes=32 * 1024 * 1024),
    )(xcol, w_packed, b_packed, mask, fcw_packed, fcb_packed)

    return out[:B, :OUT]


def _reference_forward(text, emb_table, conv_ws, conv_bs, fc_w, fc_b):
    """Pure-JAX f32 reference matching the PyTorch module (eval mode)."""
    x = jnp.take(emb_table, text, axis=0)                   # (B, L, E)
    pooled = []
    for w, b in zip(conv_ws, conv_bs):
        fs = w.shape[2]
        l_out = x.shape[1] - fs + 1
        acc = jnp.zeros((x.shape[0], l_out, w.shape[0]), jnp.float32)
        for k in range(fs):
            acc = acc + jnp.einsum('ble,fe->blf', x[:, k:k + l_out, :], w[:, :, k])
        acc = jax.nn.relu(acc + b[None, None, :])
        pooled.append(jnp.max(acc, axis=1))
    cat = jnp.concatenate(pooled, axis=-1)
    logits = cat @ fc_w.T + fc_b
    return jax.nn.log_softmax(logits, axis=-1)


if __name__ == "__main__":
    # Small shapes consistent with the module's forward.
    vocab_size = 100
    embedding_dim = 32
    n_filters = 3
    output_dim = 5
    batch = 2
    seq_len = 16

    key = jax.random.PRNGKey(0)
    keys = jax.random.split(key, 12)

    emb_table = jax.random.normal(keys[0], (vocab_size, embedding_dim),
                                  dtype=jnp.float32) * 0.1
    conv_ws = []
    conv_bs = []
    for i, fs in enumerate(FILTER_SIZES):
        conv_ws.append(jax.random.normal(
            keys[1 + i], (n_filters, embedding_dim, fs), dtype=jnp.float32) * 0.1)
        conv_bs.append(jax.random.normal(
            keys[5 + i], (n_filters,), dtype=jnp.float32) * 0.1)
    fc_w = jax.random.normal(
        keys[9], (output_dim, len(FILTER_SIZES) * n_filters),
        dtype=jnp.float32) * 0.1
    fc_b = jax.random.normal(keys[10], (output_dim,), dtype=jnp.float32) * 0.1

    text = jax.random.randint(keys[11], (batch, seq_len), 0, vocab_size,
                              dtype=jnp.int32)

    out = cnn1d_forward(text, emb_table, conv_ws, conv_bs, fc_w, fc_b)
    out = jax.block_until_ready(out)

    ref = _reference_forward(text, emb_table, conv_ws, conv_bs, fc_w, fc_b)
    assert out.shape == (batch, output_dim)
    # bf16 activations / conv / FC weights in the kernel vs f32 reference.
    assert jnp.allclose(out, ref, atol=2e-2, rtol=2e-2), (out, ref)

    print("KERNEL_OK")
</pallas_src>

<mosaic_0001>
module attributes {stable_mosaic.version = 11 : i64} {
  func.func @cnn1d_kernel(%arg0: i32, %arg1: memref<2x16x256xbf16, #tpu.memory_space<vmem>>, %arg2: memref<256x128xbf16, #tpu.memory_space<vmem>>, %arg3: memref<1x128xf32, #tpu.memory_space<vmem>>, %arg4: memref<16x128xf32, #tpu.memory_space<vmem>>, %arg5: memref<128x128xbf16, #tpu.memory_space<vmem>>, %arg6: memref<1x128xf32, #tpu.memory_space<vmem>>, %arg7: memref<2x128xf32, #tpu.memory_space<vmem>>) attributes {dimension_semantics = [#tpu.dimension_semantics<parallel>], iteration_bounds = array<i64: 1>, scalar_prefetch = 0 : i64, scratch_operands = 0 : i64, tpu.core_type = #tpu.core_type<tc>, window_params = [{transform_indices = @transform_0, window_bounds = array<i64: 2, 16, 256>}, {pipeline_mode = #tpu.pipeline_mode<synchronous>, transform_indices = @transform_1, window_bounds = array<i64: 256, 128>}, {pipeline_mode = #tpu.pipeline_mode<synchronous>, transform_indices = @transform_2, window_bounds = array<i64: 1, 128>}, {pipeline_mode = #tpu.pipeline_mode<synchronous>, transform_indices = @transform_3, window_bounds = array<i64: 16, 128>}, {pipeline_mode = #tpu.pipeline_mode<synchronous>, transform_indices = @transform_4, window_bounds = array<i64: 128, 128>}, {pipeline_mode = #tpu.pipeline_mode<synchronous>, transform_indices = @transform_5, window_bounds = array<i64: 1, 128>}, {transform_indices = @transform_6, window_bounds = array<i64: 2, 128>}]} {
    %c0 = arith.constant 0 : index
    %c0_0 = arith.constant 0 : index
    %c0_1 = arith.constant 0 : index
    %0 = vector.load %arg1[%c0, %c0_0, %c0_1] : memref<2x16x256xbf16, #tpu.memory_space<vmem>>, vector<2x16x256xbf16>
    %1 = vector.shape_cast %0 : vector<2x16x256xbf16> to vector<32x256xbf16>
    %c0_2 = arith.constant 0 : index
    %c0_3 = arith.constant 0 : index
    %2 = vector.load %arg2[%c0_2, %c0_3] : memref<256x128xbf16, #tpu.memory_space<vmem>>, vector<256x128xbf16>
    %cst = arith.constant dense<0.000000e+00> : vector<32x128xf32>
    %3 = tpu.matmul %1, %2, %cst {dimension_numbers = #tpu.dot_dimension_numbers<[1], [0], [0], [1], [0, 0, 1, 1], [], []>} : vector<32x256xbf16>, vector<256x128xbf16>, vector<32x128xf32> -> vector<32x128xf32>
    %4 = vector.shape_cast %3 : vector<32x128xf32> to vector<2x16x128xf32>
    %c0_4 = arith.constant 0 : index
    %c0_5 = arith.constant 0 : index
    %5 = vector.load %arg3[%c0_4, %c0_5] : memref<1x128xf32, #tpu.memory_space<vmem>>, vector<1x128xf32>
    %6 = vector.shape_cast %5 : vector<1x128xf32> to vector<1x1x128xf32>
    %7 = vector.broadcast %6 : vector<1x1x128xf32> to vector<2x16x128xf32>
    %8 = arith.addf %4, %7 : vector<2x16x128xf32>
    %cst_6 = arith.constant 0.000000e+00 : f32
    %9 = vector.broadcast %cst_6 : f32 to vector<2x16x128xf32>
    %10 = arith.maximumf %8, %9 : vector<2x16x128xf32>
    %c0_7 = arith.constant 0 : index
    %c0_8 = arith.constant 0 : index
    %11 = vector.load %arg4[%c0_7, %c0_8] : memref<16x128xf32, #tpu.memory_space<vmem>>, vector<16x128xf32>
    %12 = vector.shape_cast %11 : vector<16x128xf32> to vector<1x16x128xf32>
    %13 = vector.broadcast %12 : vector<1x16x128xf32> to vector<2x16x128xf32>
    %14 = arith.mulf %10, %13 : vector<2x16x128xf32>
    %cst_9 = arith.constant dense<0xFF800000> : vector<2x128xf32>
    %15 = vector.multi_reduction <maximumf>, %14, %cst_9 [1] : vector<2x16x128xf32> to vector<2x128xf32>
    %16 = arith.truncf %15 : vector<2x128xf32> to vector<2x128xbf16>
    %c0_10 = arith.constant 0 : index
    %c0_11 = arith.constant 0 : index
    %17 = vector.load %arg5[%c0_10, %c0_11] : memref<128x128xbf16, #tpu.memory_space<vmem>>, vector<128x128xbf16>
    %cst_12 = arith.constant dense<0.000000e+00> : vector<2x128xf32>
    %18 = tpu.matmul %16, %17, %cst_12 {dimension_numbers = #tpu.dot_dimension_numbers<[1], [0], [0], [1], [0, 0, 1, 1], [], []>} : vector<2x128xbf16>, vector<128x128xbf16>, vector<2x128xf32> -> vector<2x128xf32>
    %c0_13 = arith.constant 0 : index
    %c0_14 = arith.constant 0 : index
    %19 = vector.load %arg6[%c0_13, %c0_14] : memref<1x128xf32, #tpu.memory_space<vmem>>, vector<1x128xf32>
    %20 = vector.broadcast %19 : vector<1x128xf32> to vector<2x128xf32>
    %21 = arith.addf %18, %20 : vector<2x128xf32>
    %cst_15 = arith.constant dense<0xFF800000> : vector<2xf32>
    %22 = vector.multi_reduction <maximumf>, %21, %cst_15 [1] : vector<2x128xf32> to vector<2xf32>
    %23 = vector.shape_cast %22 : vector<2xf32> to vector<2x1xf32>
    %24 = vector.broadcast %23 : vector<2x1xf32> to vector<2x128xf32>
    %25 = arith.subf %21, %24 : vector<2x128xf32>
    %26 = math.exp %25 : vector<2x128xf32>
    %cst_16 = arith.constant dense<0.000000e+00> : vector<2xf32>
    %27 = vector.multi_reduction <add>, %26, %cst_16 [1] : vector<2x128xf32> to vector<2xf32>
    %28 = vector.shape_cast %27 : vector<2xf32> to vector<2x1xf32>
    %29 = math.log %28 : vector<2x1xf32>
    %30 = vector.broadcast %29 : vector<2x1xf32> to vector<2x128xf32>
    %31 = arith.subf %25, %30 : vector<2x128xf32>
    %c0_17 = arith.constant 0 : index
    %c0_18 = arith.constant 0 : index
    %32 = vector.load %arg7[%c0_17, %c0_18] : memref<2x128xf32, #tpu.memory_space<vmem>>, vector<2x128xf32>
    tpu.vector_store %arg7[%c0_17, %c0_18], %31 {strides = array<i32>} : memref<2x128xf32, #tpu.memory_space<vmem>>, vector<2x128xf32>,
    return
  }
  func.func @transform_0(%arg0: i32) -> (i32, i32, i32) {
    %c0_i32 = arith.constant 0 : i32
    %c0_i32_0 = arith.constant 0 : i32
    %c0_i32_1 = arith.constant 0 : i32
    return %arg0, %c0_i32, %c0_i32_0 : i32, i32, i32
  }
  func.func @transform_1(%arg0: i32) -> (i32, i32) {
    %c0_i32 = arith.constant 0 : i32
    %c0_i32_0 = arith.constant 0 : i32
    %c0_i32_1 = arith.constant 0 : i32
    return %c0_i32, %c0_i32_0 : i32, i32
  }
  func.func @transform_2(%arg0: i32) -> (i32, i32) {
    %c0_i32 = arith.constant 0 : i32
    %c0_i32_0 = arith.constant 0 : i32
    %c0_i32_1 = arith.constant 0 : i32
    return %c0_i32, %c0_i32_0 : i32, i32
  }
  func.func @transform_3(%arg0: i32) -> (i32, i32) {
    %c0_i32 = arith.constant 0 : i32
    %c0_i32_0 = arith.constant 0 : i32
    %c0_i32_1 = arith.constant 0 : i32
    return %c0_i32, %c0_i32_0 : i32, i32
  }
  func.func @transform_4(%arg0: i32) -> (i32, i32) {
    %c0_i32 = arith.constant 0 : i32
    %c0_i32_0 = arith.constant 0 : i32
    %c0_i32_1 = arith.constant 0 : i32
    return %c0_i32, %c0_i32_0 : i32, i32
  }
  func.func @transform_5(%arg0: i32) -> (i32, i32) {
    %c0_i32 = arith.constant 0 : i32
    %c0_i32_0 = arith.constant 0 : i32
    %c0_i32_1 = arith.constant 0 : i32
    return %c0_i32, %c0_i32_0 : i32, i32
  }
  func.func @transform_6(%arg0: i32) -> (i32, i32) {
    %c0_i32 = arith.constant 0 : i32
    %c0_i32_0 = arith.constant 0 : i32
    return %arg0, %c0_i32 : i32, i32
  }
}

</mosaic_0001>

<bundles_post_ra>
// kernel: cnn1d_forward.1
= control target key start
LH: loop header
LB: loop body
LE: loop exit
PB: predicated region body
PF: predicated region fallthrough
CT: control target
= control target key end

     0   :  { %s695_s0 = inlined_call_operand.vmem [shape: bf16[2,16,256], index: 0, kind: input, shape index: {}]   ;;  %s696_s1 = inlined_call_operand.vmem [shape: bf16[256,128], index: 1, kind: input, shape index: {}]   ;;  %s697_s2 = inlined_call_operand.vmem [shape: f32[1,128], index: 2, kind: input, shape index: {}]   ;;  %s698_s3 = inlined_call_operand.vmem [shape: f32[16,128], index: 3, kind: input, shape index: {}]   ;;  %s699_s4 = inlined_call_operand.vmem [shape: bf16[128,128], index: 4, kind: input, shape index: {}]   ;;  %s700_s5 = inlined_call_operand.vmem [shape: f32[1,128], index: 5, kind: input, shape index: {}]   ;;  %s701_s6 = inlined_call_operand.hbm [shape: f32[2,128], index: 6, kind: output, shape index: {}]  }
   0x1   :  { %v490_v0 = vld [vmem:[%s696_s1 + $0x38] sm:$0xff]  ;;  %v489_v2 = vld [vmem:[%s696_s1 + $0x30] sm:$0xff]  ;;  %v488_v4 = vld [vmem:[%s696_s1 + $0x28] sm:$0xff] }
   0x2   :  { %v498_v1 = vld [vmem:[%s696_s1 + $0x78] sm:$0xff]  ;;  %176 = vmatpush.bf16.msra.mxu0 %v490_v0  ;;  %v497_v3 = vld [vmem:[%s696_s1 + $0x70] sm:$0xff]  ;;  %507 = vmatpush.bf16.msra.mxu3 %v490_v0  ;;  %v496_v5 = vld [vmem:[%s696_s1 + $0x68] sm:$0xff] }
   0x3   :  { %195 = vmatpush.bf16.msra.mxu1 %v498_v1 }
   0x6   :  { %177 = vmatpush.bf16.msra.mxu0 %v489_v2  ;;  %508 = vmatpush.bf16.msra.mxu3 %v489_v2 }
   0x7   :  { %196 = vmatpush.bf16.msra.mxu1 %v497_v3 }
   0x8   :  { %11 = vsyncpa [#allocation3], 0  ;;  %v487_v6 = vld [vmem:[%s696_s1 + $0x20] sm:$0xff]  ;;  %v486_v8 = vld [vmem:[%s696_s1 + $0x18] sm:$0xff]  ;;  %vm272_vm0 = vcmask 1041409   ;;  %vm337_vm1 = vcmask 1041408  }
   0x9   :  { %v495_v7 = vld [vmem:[%s696_s1 + $0x60] sm:$0xff]  ;;  %v494_v9 = vld [vmem:[%s696_s1 + $0x58] sm:$0xff]  ;;  %v485_v10 = vld [vmem:[%s696_s1 + $0x10] sm:$0xff]  ;;  %s548_s15 = smov [#allocation2]   ;;  %s358_s18 = sshll.u32 %s701_s6, 4  ;;  %s359_s18 = int_to_ptr.hbm [resolvable:$true] %s358_s18 }
   0xa   :  { %178 = vmatpush.bf16.msra.mxu0 %v488_v4  ;;  %509 = vmatpush.bf16.msra.mxu3 %v488_v4  ;;  %v493_v11 = vld [vmem:[%s696_s1 + $0x50] sm:$0xff]  ;;  %v484_v12 = vld [vmem:[%s696_s1 + $0x8] sm:$0xff]  ;;  %v483_v14 = vld [vmem:[%s696_s1] sm:$0xff]  ;;  %s356_s16 = sshll.u32 %s548_s15, 4  ;;  %s357_s16 = int_to_ptr.vmem [resolvable:$true] %s356_s16 }
   0xb   :  { %197 = vmatpush.bf16.msra.mxu1 %v496_v5  ;;  %v492_v13 = vld [vmem:[%s696_s1 + $0x48] sm:$0xff]  ;;  %v491_v15 = vld [vmem:[%s696_s1 + $0x40] sm:$0xff]  ;;  %v377_v20 = vld [vmem:[%s695_s0 + $0x10] sm:$0xf] }
   0xc   :  { %v369_v16 = vld [vmem:[%s695_s0] sm:$0xf]  ;;  %v480_v17 = vld [vmem:[%s695_s0 + $0x4] sm:$0xf0]  ;;  %v479_v18 = vld [vmem:[%s695_s0 + $0x4] sm:$0xf] }
   0xd   :  { %v371_v19 = vld [vmem:[%s695_s0 + $0x8] sm:$0xf0]  ;;  %v482_v21 = vld [vmem:[%s695_s0 + $0x14] sm:$0xf0]  ;;  %v370_v22 = vor.u32 %v480_v17, %v369_v16  ;;  %v481_v25 = vld [vmem:[%s695_s0 + $0x14] sm:$0xf] }
   0xe   :  { %179 = vmatpush.bf16.msra.mxu0 %v487_v6  ;;  %510 = vmatpush.bf16.msra.mxu3 %v487_v6  ;;  %v374_v23 = vor.u32 %v479_v18, %v371_v19  ;;  %v378_v24 = vor.u32 %v482_v21, %v377_v20  ;;  %v379_v26 = vld [vmem:[%s695_s0 + $0x18] sm:$0xf0]  ;;  %v505_v29 = vld [vmem:[%s699_s4 + $0x30] sm:$0xff]  ;;  %v504_v30 = vld [vmem:[%s699_s4 + $0x28] sm:$0xff] }
   0xf   :  { %198 = vmatpush.bf16.msra.mxu1 %v495_v7  ;;  %v382_v27 = vor.u32 %v481_v25, %v379_v26  ;;  %v506_v28 = vld [vmem:[%s699_s4 + $0x38] sm:$0xff]  ;;  %v503_v33 = vld [vmem:[%s699_s4 + $0x20] sm:$0xff]  ;;  %v501_v38 = vld [vmem:[%s699_s4 + $0x10] sm:$0xff] }
  0x10   :  { %324 = vmatpush.bf16.msra.mxu2 %v506_v28  ;;  %v516_v35 = vld [vmem:[%s697_s2] ss:$0 sm:$0xff]  ;;  %v502_v36 = vld [vmem:[%s699_s4 + $0x18] sm:$0xff]  ;;  %v500_v44 = vld [vmem:[%s699_s4 + $0x8] sm:$0xff] }
  0x11   :  { %v226_v45 = vld [vmem:[%s698_s3] sm:$0xff]  ;;  %v227_v46 = vld [vmem:[%s698_s3 + $0x8] sm:$0xff] }
  0x12   :  { %180 = vmatpush.bf16.msra.mxu0 %v486_v8  ;;  %511 = vmatpush.bf16.msra.mxu3 %v486_v8  ;;  %v499_v51 = vld [vmem:[%s699_s4] sm:$0xff] }
  0x13   :  { %199 = vmatpush.bf16.msra.mxu1 %v494_v9  ;;  %v517_v19 = vld [vmem:[%s700_s5] ss:$0 sm:$0xff] }
  0x14   :  { %325 = vmatpush.bf16.msra.mxu2 %v505_v29 }
  0x16   :  { %181 = vmatpush.bf16.msra.mxu0 %v485_v10  ;;  %512 = vmatpush.bf16.msra.mxu3 %v485_v10 }
  0x17   :  { %200 = vmatpush.bf16.msra.mxu1 %v493_v11 }
  0x18   :  { %326 = vmatpush.bf16.msra.mxu2 %v504_v30 }
  0x1a   :  { %182 = vmatpush.bf16.msra.mxu0 %v484_v12  ;;  %513 = vmatpush.bf16.msra.mxu3 %v484_v12 }
  0x1b   :  { %201 = vmatpush.bf16.msra.mxu1 %v492_v13 }
  0x1c   :  { %327 = vmatpush.bf16.msra.mxu2 %v503_v33 }
  0x1e   :  { %183 = vmatpush.bf16.msra.mxu0 %v483_v14  ;;  %514 = vmatpush.bf16.msra.mxu3 %v483_v14 }
  0x1f   :  { %202 = vmatpush.bf16.msra.mxu1 %v491_v15 }
  0x20   :  { %328 = vmatpush.bf16.msra.mxu2 %v502_v36 }
  0x21   :  { %184 = vmatmul.bf16.vlgmr.msra.gmra.mxu0 %v370_v22  ;;  %189 = vmatmul.bf16.vlgmr.msra.gmra.mxu3 %v378_v24 }
  0x22   :  { %203 = vmatmul.bf16.vlgmr.msra.gmra.mxu1 %v374_v23 }
  0x24   :  { %329 = vmatpush.bf16.msra.mxu2 %v501_v38 }
  0x28   :  { %330 = vmatpush.bf16.msra.mxu2 %v500_v44 }
  0x2c   :  { %331 = vmatpush.bf16.msra.mxu2 %v499_v51 }
  0x32   :  { %208 = vmatmul.bf16.gmra.mxu1 %v382_v27 }
  0x9e   :  { %v185_v31 = vpop.f32.mrf.mxu0 }
  0x9f   :  { %v204_v32 = vpop.f32.mrf.mxu1 }
  0xa0   :  { %v205_v34 = vadd.f32 %v204_v32, %v185_v31 }
  0xa2   :  { %v218_v37 = vadd.f32 %v516_v35, %v205_v34 }
  0xa4   :  { %v222_v42 = vmax.f32 %v218_v37, 0.0  ;;  %v190_v48 = vpop.f32.mrf.mxu3 }
  0xa6   :  { %v187_v39 = vpop.f32.mrf.mxu0  ;;  %v228_v49 = vmul.f32 %v226_v45, %v222_v42 }
  0xa7   :  { %v206_v40 = vpop.f32.mrf.mxu1 }
  0xa8   :  { %v207_v41 = vadd.f32 %v206_v40, %v187_v39 }
  0xaa   :  { %v219_v43 = vadd.f32 %v516_v35, %v207_v41 }
  0xac   :  { %v223_v47 = vmax.f32 %v219_v43, 0.0  ;;  %v192_v57 = vpop.f32.mrf.mxu3 }
  0xae   :  { %v229_v50 = vmul.f32 %v227_v46, %v223_v47 }
  0xaf   :  { %v209_v52 = vpop.f32.mrf.mxu1 }
  0xb0   :  { %v232_v53 = vmax.f32 %v228_v49, %v229_v50  ;;  %v210_v54 = vadd.f32 %v209_v52, %v190_v48 }
  0xb2   :  { %v233_v55 = vrot.slane %v232_v53, 4  ;;  %v220_v56 = vadd.f32 %v516_v35, %v210_v54 }
  0xb4   :  { %v234_v59 = vmax.f32 %v232_v53, %v233_v55  ;;  %v224_v61 = vmax.f32 %v220_v56, 0.0 }
  0xb6   :  { %v235_v63 = vrot.slane %v234_v59, 2  ;;  %v230_v1 = vmul.f32 %v226_v45, %v224_v61 }
  0xb7   :  { %v211_v58 = vpop.f32.mrf.mxu1 }
  0xb8   :  { %v212_v60 = vadd.f32 %v211_v58, %v192_v57  ;;  %v236_v4 = vmax.f32 %v234_v59, %v235_v63 }
  0xba   :  { %v221_v62 = vadd.f32 %v516_v35, %v212_v60  ;;  %v237_v7 = vrot.slane %v236_v4, 1 }
  0xbc   :  { %v225_v0 = vmax.f32 %v221_v62, 0.0  ;;  %v238_v9 = vmax.f32 %v236_v4, %v237_v7 }
  0xbe   :  { %v231_v2 = vmul.f32 %v227_v46, %v225_v0  ;;  %v246_v13 = vpack.c.bf16 %v238_v9, %v238_v9 }
  0xc0   :  { %v239_v3 = vmax.f32 %v230_v1, %v231_v2  ;;  %v270_v15 = vunpack.c.l.b16 %v246_v13 }
  0xc2   :  { %v240_v5 = vrot.slane %v239_v3, 4 }
  0xc4   :  { %v241_v6 = vmax.f32 %v239_v3, %v240_v5 }
  0xc6   :  { %v242_v8 = vrot.slane %v241_v6, 2 }
  0xc8   :  { %v243_v10 = vmax.f32 %v241_v6, %v242_v8 }
  0xca   :  { %v244_v11 = vrot.slane %v243_v10, 1 }
  0xcc   :  { %v245_v12 = vmax.f32 %v243_v10, %v244_v11 }
  0xce   :  { %v247_v14 = vpack.c.bf16 %v245_v12, %v245_v12 }
  0xd0   :  { %v271_v16 = vunpack.c.l.b16 %v247_v14 }
  0xd2   :  { %v273_v17 = vsel %vm272_vm0, %v271_v16, %v270_v15 }
  0xd3   :  { %v274_v18 = vpack.c.b16 %v273_v17, %v273_v17 }
  0xd5   :  { %332 = vmatmul.bf16.vlgmr.msra.gmra.mxu2 %v274_v18 }
 0x158   :  { %v333_v20 = vpop.f32.mrf.mxu2 }
 0x159   :  { %v334_v21 = vadd.f32 %v517_v19, %v333_v20 }
 0x15b   :  { %v338_v22 = vsel %vm337_vm1, %v334_v21, -inf }
 0x15c   :  { %339 = vmax.xlane.f32.xlu0 %v338_v22 }
 0x160   :  { %v335_v23 = vpop.f32.mrf.mxu2 }
 0x1cf   :  { %v340_v24 = vpop.xlane.xlu0 %339 }
 0x1d0   :  { %v341_v25 = vsub.f32 %v334_v21, %v340_v24 }
 0x1d2   :  { %v342_v26 = vmul.f32 1.442695, %v341_v25 }
 0x1d4   :  { %518 = vpow2.f32 %v342_v26 }
 0x1da   :  { %v519_v27 = vpop.eup %518 }
 0x1db   :  { %v344_v28 = vsel %vm337_vm1, %v519_v27, 0.0 }
 0x1dc   :  { %345 = vadd.xlane.f32.xlu0 %v344_v28 }
 0x24f   :  { %v346_v29 = vpop.xlane.xlu0 %345 }
 0x250   :  { %520 = vlog2.f32 %v346_v29 }
 0x256   :  { %v521_v30 = vpop.eup %520 }
 0x257   :  { %v348_v31 = vmul.f32 0.6931472, %v521_v30 }
 0x259   :  { %v349_v32 = vsub.f32 %v341_v25, %v348_v31 }
 0x25b   :  { %350 = vst [vmem:[#allocation2] sm:$0x3] %v349_v32 }
 0x25c   :  { %361 = dma.vmem_to_hbm [thread:$0]  %s357_s16, 32, %s359_s18, [#allocation3]  }
 0x25d   :  { %546 = dma.done.wait [#allocation3], 32  }
 0x25e   :  { %547 = vsyncadd [#allocation3], 4294967264 }
 0x25f   :  { %366 = vsyncpa [#allocation3], 1 }

</bundles_post_ra>
